<compile_context>
chip_gen: v7x
topology: tpu7x:2x2x1
jax: 0.10.0
libtpu: 0.0.40
codegen_flags: <defaults>
</compile_context>

<pallas_src>
import functools

import jax
import jax.numpy as jnp
import numpy as np
from jax.experimental import pallas as pl
from jax.experimental.pallas import tpu as pltpu


def _bilstm_cls_kernel(
    xa_ref,     # (T*Bp, E+1)  : x padded to Bp rows per step, ones column appended
    wih_ref,    # (E+1, 8H)    : [Wih_f^T | Wih_r^T] gate-permuted, last row = biases
    wb_ref,     # (3H+1, W2)   : rows 0:H   = Whh_f^T (gate-permuted, lanes 0:4H)
                #                rows H:3H  = W12 = W1^T @ W2^T   (lanes 0:Cp)
                #                row  3H    = b12 = b1 W2^T + b2  (lanes 0:Cp)
    out_ref,    # (Bp, Cp)     : lane-dense output
    *, seq_len: int, batch_pad: int, hidden: int, classes_pad: int,
):
    T, Bp, H, Cp = seq_len, batch_pad, hidden, classes_pad
    H2, H3, H4 = 2 * H, 3 * H, 4 * H

    # One fused input projection for BOTH directions, bias folded in via the
    # ones column: (T*Bp, E+1) @ (E+1, 8H) -> (T*Bp, 8H).  Hoisted off the
    # serial path; the recurrence below only does h @ Whh per step.
    xw = jnp.dot(xa_ref[...], wih_ref[...], preferred_element_type=jnp.float32)

    # Hoist the recurrent weight out of the unrolled loop (stateful-ref loads
    # inside the body would be re-issued up to T times).
    whh = wb_ref[0:H, 0:H4]                                       # (H, 4H)

    def gate_math(pre, c_prev):
        # Gate columns are pre-permuted to [i, f, o | g]: one contiguous
        # sigmoid + one contiguous tanh per step (plus tanh(c_new)).
        s = jax.nn.sigmoid(pre[:, 0:H3])
        g = jnp.tanh(pre[:, H3:H4])
        i, f, o = s[:, 0:H], s[:, H:H2], s[:, H2:H3]
        c_new = f * c_prev + i * g
        h_new = o * jnp.tanh(c_new)
        return h_new, c_new

    h = jnp.zeros((Bp, H), jnp.float32)
    c = jnp.zeros((Bp, H), jnp.float32)

    # Fully unrolled time recurrence (T is a small static constant); every xw
    # slice is static, sublane-aligned (Bp multiple of 8) and lane-tile aligned.
    for t in range(T):
        pre = xw[t * Bp:(t + 1) * Bp, 0:H4] + jnp.dot(
            h, whh, preferred_element_type=jnp.float32)           # (Bp, 4H)
        h, c = gate_math(pre, c)

    # Reverse direction: result[-1]'s backward half is the reverse LSTM's
    # *first* step (it has only seen x[T-1]).  With zero initial state the
    # h @ Whh_r term vanishes, so one gate evaluation from the already-computed
    # xw lanes 4H:8H is exact.
    h_r, _ = gate_math(xw[(T - 1) * Bp:T * Bp, H4:2 * H4],
                       jnp.zeros((Bp, H), jnp.float32))

    # Fused classifier head: linear2(linear1(feat)) == feat @ (W1 W2) + (b1 W2 + b2),
    # with concat([h, h_r]) replaced by two K=H matmuls into one accumulator.
    z = (jnp.dot(h, wb_ref[H:H2, 0:Cp], preferred_element_type=jnp.float32)
         + jnp.dot(h_r, wb_ref[H2:H3, 0:Cp], preferred_element_type=jnp.float32)
         + wb_ref[H3:H3 + 1, 0:Cp])                                # (Bp, Cp)
    out_ref[...] = z.astype(out_ref.dtype)                         # unmasked lane-dense store


def _permute_gates(w):
    """Reorder the last axis from PyTorch's [i, f, g, o] to [i, f, o, g]."""
    H = w.shape[-1] // 4
    return jnp.concatenate(
        [w[..., :2 * H], w[..., 3 * H:4 * H], w[..., 2 * H:3 * H]], axis=-1)


def prepare_weight_blobs(params, *, hidden: int, classes: int):
    """Pack all weights/biases into two DMA-friendly blobs.  Run ONCE per weight set."""
    H, C = hidden, classes
    Cp = ((C + 127) // 128) * 128       # pad classes to full lanes -> unmasked vst
    W2 = max(4 * H, Cp)

    # Blob 1: fused, gate-permuted input projection for both directions with the
    # (b_ih + b_hh) biases as an extra trailing row:  (E+1, 8H).
    wih_f = _permute_gates(params["wih_f"])
    wih_r = _permute_gates(params["wih_r"])
    b_f = _permute_gates(params["b_f"])
    b_r = _permute_gates(params["b_r"])
    wih_blob = jnp.concatenate(
        [jnp.concatenate([wih_f, wih_r], axis=1),
         jnp.concatenate([b_f, b_r], axis=1)], axis=0)             # (E+1, 8H)

    # Blob 2: recurrent weight + exactly-folded classifier head, one DMA.
    whh_f = _permute_gates(params["whh_f"])                        # (H, 4H)
    w2p = jnp.pad(params["w2"], ((0, 0), (0, Cp - C)))             # (H, Cp)
    b2p = jnp.pad(params["b2"], ((0, 0), (0, Cp - C)))             # (1, Cp)
    w12 = params["w1"] @ w2p                                       # (2H, Cp)
    b12 = params["b1"] @ w2p + b2p                                 # (1, Cp)
    pad_w = lambda a: jnp.pad(a, ((0, 0), (0, W2 - a.shape[1])))
    wb_blob = jnp.concatenate([pad_w(whh_f), pad_w(w12), pad_w(b12)],
                              axis=0)                              # (3H+1, W2)
    return wih_blob, wb_blob


def bilstm_text_classifier(x, wih_blob, wb_blob, *, hidden: int, classes: int):
    """x: (T, B, E) float32; blobs from prepare_weight_blobs."""
    T, B, E = x.shape
    H, C = hidden, classes
    Bp = ((B + 7) // 8) * 8            # pad batch to full sublanes
    Cp = ((C + 127) // 128) * 128

    # Wrapper-side layout plumbing (cheap XLA ops, outside the kernel).
    # Padded batch rows carry garbage through the pipeline; rows never mix and
    # the padding is sliced off at the end.
    x_pad = jnp.pad(x, ((0, 0), (0, Bp - B), (0, 0)))
    x_aug = jnp.concatenate([x_pad, jnp.ones((T, Bp, 1), x.dtype)], axis=-1)
    x_aug = x_aug.reshape(T * Bp, E + 1)

    kernel = functools.partial(_bilstm_cls_kernel, seq_len=T, batch_pad=Bp,
                               hidden=H, classes_pad=Cp)
    vmem = pl.BlockSpec(memory_space=pltpu.MemorySpace.VMEM)
    out = pl.pallas_call(
        kernel,
        out_shape=jax.ShapeDtypeStruct((Bp, Cp), jnp.float32),
        in_specs=[vmem, vmem, vmem],
        out_specs=vmem,
    )(x_aug, wih_blob, wb_blob)
    # TODO(synk): at realistic batch sizes add a batch grid axis
    # (dimension_semantics=("parallel",)) so v7x's two TensorCores are used.
    return out[:B, :C]


def _reference(x, p, *, hidden: int):
    """Pure-JAX reference matching the PyTorch forward()."""
    T, B, E = x.shape
    H = hidden

    def step(x_t, h, c, wih_t, whh_t, b):
        g = x_t @ wih_t + h @ whh_t + b
        i = jax.nn.sigmoid(g[:, :H])
        f = jax.nn.sigmoid(g[:, H:2 * H])
        gg = jnp.tanh(g[:, 2 * H:3 * H])
        o = jax.nn.sigmoid(g[:, 3 * H:])
        c = f * c + i * gg
        h = o * jnp.tanh(c)
        return h, c

    h = jnp.zeros((B, H), jnp.float32)
    c = jnp.zeros((B, H), jnp.float32)
    for t in range(T):
        h, c = step(x[t], h, c, p["wih_f"], p["whh_f"], p["b_f"])
    hr, _ = step(x[T - 1], jnp.zeros((B, H)), jnp.zeros((B, H)),
                 p["wih_r"], p["whh_r"], p["b_r"])
    feat = jnp.concatenate([h, hr], axis=-1)
    return (feat @ p["w1"] + p["b1"]) @ p["w2"] + p["b2"]


if __name__ == "__main__":
    # Small shapes consistent with the module: seq=8, batch=2, embedding=16,
    # hidden=32 (so 4H = 128 gate lanes), classes=4.
    T, B, E, H, C = 8, 2, 16, 32, 4

    key = jax.random.PRNGKey(0)
    ks = jax.random.split(key, 16)
    bound = 1.0 / np.sqrt(H)   # PyTorch default LSTM/Linear init scale
    u = lambda k, shape: jax.random.uniform(k, shape, jnp.float32, -bound, bound)

    params = {
        # LSTM weights stored pre-transposed: W_ih^T (E,4H), W_hh^T (H,4H);
        # biases are b_ih + b_hh (PyTorch adds both), kept 2D for TPU layout.
        "wih_f": u(ks[0], (E, 4 * H)),
        "whh_f": u(ks[1], (H, 4 * H)),
        "b_f":   u(ks[2], (1, 4 * H)) + u(ks[3], (1, 4 * H)),
        "wih_r": u(ks[4], (E, 4 * H)),
        "whh_r": u(ks[5], (H, 4 * H)),   # only used by the reference (zero initial state)
        "b_r":   u(ks[6], (1, 4 * H)) + u(ks[7], (1, 4 * H)),
        # Linear layers, pre-transposed: W1^T (2H,H), W2^T (H,C).
        "w1": u(ks[8], (2 * H, H)),
        "b1": u(ks[9], (1, H)),
        "w2": u(ks[10], (H, C)),
        "b2": u(ks[11], (1, C)),
    }

    x = jax.random.normal(ks[12], (T, B, E), jnp.float32)

    wih_blob, wb_blob = prepare_weight_blobs(params, hidden=H, classes=C)
    out = bilstm_text_classifier(x, wih_blob, wb_blob, hidden=H, classes=C)
    out = jax.block_until_ready(out)

    ref = _reference(x, params, hidden=H)
    # Slightly loosened vs 1e-5: the exact classifier fold / fused bias column
    # regroup f32 accumulations at the ulp level.
    np.testing.assert_allclose(np.asarray(out), np.asarray(ref),
                               rtol=1e-4, atol=1e-5)

    print("KERNEL_OK")
</pallas_src>

<mosaic_0001>
module attributes {stable_mosaic.version = 11 : i64} {
  func.func @_bilstm_cls_kernel(%arg0: memref<64x17xf32, #tpu.memory_space<vmem>>, %arg1: memref<17x256xf32, #tpu.memory_space<vmem>>, %arg2: memref<97x128xf32, #tpu.memory_space<vmem>>, %arg3: memref<8x128xf32, #tpu.memory_space<vmem>>) attributes {dimension_semantics = [], scalar_prefetch = 0 : i64, scratch_operands = 0 : i64, tpu.core_type = #tpu.core_type<tc>} {
    %c0 = arith.constant 0 : index
    %c0_0 = arith.constant 0 : index
    %0 = vector.load %arg0[%c0, %c0_0] : memref<64x17xf32, #tpu.memory_space<vmem>>, vector<64x17xf32>
    %c0_1 = arith.constant 0 : index
    %c0_2 = arith.constant 0 : index
    %1 = vector.load %arg1[%c0_1, %c0_2] : memref<17x256xf32, #tpu.memory_space<vmem>>, vector<17x256xf32>
    %cst = arith.constant dense<0.000000e+00> : vector<64x256xf32>
    %2 = tpu.matmul %0, %1, %cst {dimension_numbers = #tpu.dot_dimension_numbers<[1], [0], [0], [1], [0, 0, 1, 1], [], []>} : vector<64x17xf32>, vector<17x256xf32>, vector<64x256xf32> -> vector<64x256xf32>
    %c0_3 = arith.constant 0 : index
    %c0_4 = arith.constant 0 : index
    %3 = vector.load %arg2[%c0_3, %c0_4] : memref<97x128xf32, #tpu.memory_space<vmem>>, vector<32x128xf32>
    %cst_5 = arith.constant 0.000000e+00 : f32
    %4 = vector.broadcast %cst_5 : f32 to vector<8x32xf32>
    %cst_6 = arith.constant 0.000000e+00 : f32
    %5 = vector.broadcast %cst_6 : f32 to vector<8x32xf32>
    %6 = vector.extract_strided_slice %2 {offsets = [0, 0], sizes = [8, 128], strides = [1, 1]} : vector<64x256xf32> to vector<8x128xf32>
    %cst_7 = arith.constant dense<0.000000e+00> : vector<8x128xf32>
    %7 = tpu.matmul %4, %3, %cst_7 {dimension_numbers = #tpu.dot_dimension_numbers<[1], [0], [0], [1], [0, 0, 1, 1], [], []>} : vector<8x32xf32>, vector<32x128xf32>, vector<8x128xf32> -> vector<8x128xf32>
    %8 = arith.addf %6, %7 : vector<8x128xf32>
    %9 = vector.extract_strided_slice %8 {offsets = [0, 0], sizes = [8, 96], strides = [1, 1]} : vector<8x128xf32> to vector<8x96xf32>
    %10 = arith.negf %9 : vector<8x96xf32>
    %11 = math.exp %10 : vector<8x96xf32>
    %cst_8 = arith.constant 1.000000e+00 : f32
    %12 = vector.broadcast %cst_8 : f32 to vector<8x96xf32>
    %13 = arith.addf %12, %11 : vector<8x96xf32>
    %14 = arith.divf %12, %13 : vector<8x96xf32>
    %15 = vector.extract_strided_slice %8 {offsets = [0, 96], sizes = [8, 32], strides = [1, 1]} : vector<8x128xf32> to vector<8x32xf32>
    %16 = math.tanh %15 : vector<8x32xf32>
    %17 = vector.extract_strided_slice %14 {offsets = [0, 0], sizes = [8, 32], strides = [1, 1]} : vector<8x96xf32> to vector<8x32xf32>
    %18 = vector.extract_strided_slice %14 {offsets = [0, 32], sizes = [8, 32], strides = [1, 1]} : vector<8x96xf32> to vector<8x32xf32>
    %19 = vector.extract_strided_slice %14 {offsets = [0, 64], sizes = [8, 32], strides = [1, 1]} : vector<8x96xf32> to vector<8x32xf32>
    %20 = arith.mulf %18, %5 : vector<8x32xf32>
    %21 = arith.mulf %17, %16 : vector<8x32xf32>
    %22 = arith.addf %20, %21 : vector<8x32xf32>
    %23 = math.tanh %22 : vector<8x32xf32>
    %24 = arith.mulf %19, %23 : vector<8x32xf32>
    %25 = vector.extract_strided_slice %2 {offsets = [8, 0], sizes = [8, 128], strides = [1, 1]} : vector<64x256xf32> to vector<8x128xf32>
    %cst_9 = arith.constant dense<0.000000e+00> : vector<8x128xf32>
    %26 = tpu.matmul %24, %3, %cst_9 {dimension_numbers = #tpu.dot_dimension_numbers<[1], [0], [0], [1], [0, 0, 1, 1], [], []>} : vector<8x32xf32>, vector<32x128xf32>, vector<8x128xf32> -> vector<8x128xf32>
    %27 = arith.addf %25, %26 : vector<8x128xf32>
    %28 = vector.extract_strided_slice %27 {offsets = [0, 0], sizes = [8, 96], strides = [1, 1]} : vector<8x128xf32> to vector<8x96xf32>
    %29 = arith.negf %28 : vector<8x96xf32>
    %30 = math.exp %29 : vector<8x96xf32>
    %cst_10 = arith.constant 1.000000e+00 : f32
    %31 = vector.broadcast %cst_10 : f32 to vector<8x96xf32>
    %32 = arith.addf %31, %30 : vector<8x96xf32>
    %33 = arith.divf %31, %32 : vector<8x96xf32>
    %34 = vector.extract_strided_slice %27 {offsets = [0, 96], sizes = [8, 32], strides = [1, 1]} : vector<8x128xf32> to vector<8x32xf32>
    %35 = math.tanh %34 : vector<8x32xf32>
    %36 = vector.extract_strided_slice %33 {offsets = [0, 0], sizes = [8, 32], strides = [1, 1]} : vector<8x96xf32> to vector<8x32xf32>
    %37 = vector.extract_strided_slice %33 {offsets = [0, 32], sizes = [8, 32], strides = [1, 1]} : vector<8x96xf32> to vector<8x32xf32>
    %38 = vector.extract_strided_slice %33 {offsets = [0, 64], sizes = [8, 32], strides = [1, 1]} : vector<8x96xf32> to vector<8x32xf32>
    %39 = arith.mulf %37, %22 : vector<8x32xf32>
    %40 = arith.mulf %36, %35 : vector<8x32xf32>
    %41 = arith.addf %39, %40 : vector<8x32xf32>
    %42 = math.tanh %41 : vector<8x32xf32>
    %43 = arith.mulf %38, %42 : vector<8x32xf32>
    %44 = vector.extract_strided_slice %2 {offsets = [16, 0], sizes = [8, 128], strides = [1, 1]} : vector<64x256xf32> to vector<8x128xf32>
    %cst_11 = arith.constant dense<0.000000e+00> : vector<8x128xf32>
    %45 = tpu.matmul %43, %3, %cst_11 {dimension_numbers = #tpu.dot_dimension_numbers<[1], [0], [0], [1], [0, 0, 1, 1], [], []>} : vector<8x32xf32>, vector<32x128xf32>, vector<8x128xf32> -> vector<8x128xf32>
    %46 = arith.addf %44, %45 : vector<8x128xf32>
    %47 = vector.extract_strided_slice %46 {offsets = [0, 0], sizes = [8, 96], strides = [1, 1]} : vector<8x128xf32> to vector<8x96xf32>
    %48 = arith.negf %47 : vector<8x96xf32>
    %49 = math.exp %48 : vector<8x96xf32>
    %cst_12 = arith.constant 1.000000e+00 : f32
    %50 = vector.broadcast %cst_12 : f32 to vector<8x96xf32>
    %51 = arith.addf %50, %49 : vector<8x96xf32>
    %52 = arith.divf %50, %51 : vector<8x96xf32>
    %53 = vector.extract_strided_slice %46 {offsets = [0, 96], sizes = [8, 32], strides = [1, 1]} : vector<8x128xf32> to vector<8x32xf32>
    %54 = math.tanh %53 : vector<8x32xf32>
    %55 = vector.extract_strided_slice %52 {offsets = [0, 0], sizes = [8, 32], strides = [1, 1]} : vector<8x96xf32> to vector<8x32xf32>
    %56 = vector.extract_strided_slice %52 {offsets = [0, 32], sizes = [8, 32], strides = [1, 1]} : vector<8x96xf32> to vector<8x32xf32>
    %57 = vector.extract_strided_slice %52 {offsets = [0, 64], sizes = [8, 32], strides = [1, 1]} : vector<8x96xf32> to vector<8x32xf32>
    %58 = arith.mulf %56, %41 : vector<8x32xf32>
    %59 = arith.mulf %55, %54 : vector<8x32xf32>
    %60 = arith.addf %58, %59 : vector<8x32xf32>
    %61 = math.tanh %60 : vector<8x32xf32>
    %62 = arith.mulf %57, %61 : vector<8x32xf32>
    %63 = vector.extract_strided_slice %2 {offsets = [24, 0], sizes = [8, 128], strides = [1, 1]} : vector<64x256xf32> to vector<8x128xf32>
    %cst_13 = arith.constant dense<0.000000e+00> : vector<8x128xf32>
    %64 = tpu.matmul %62, %3, %cst_13 {dimension_numbers = #tpu.dot_dimension_numbers<[1], [0], [0], [1], [0, 0, 1, 1], [], []>} : vector<8x32xf32>, vector<32x128xf32>, vector<8x128xf32> -> vector<8x128xf32>
    %65 = arith.addf %63, %64 : vector<8x128xf32>
    %66 = vector.extract_strided_slice %65 {offsets = [0, 0], sizes = [8, 96], strides = [1, 1]} : vector<8x128xf32> to vector<8x96xf32>
    %67 = arith.negf %66 : vector<8x96xf32>
    %68 = math.exp %67 : vector<8x96xf32>
    %cst_14 = arith.constant 1.000000e+00 : f32
    %69 = vector.broadcast %cst_14 : f32 to vector<8x96xf32>
    %70 = arith.addf %69, %68 : vector<8x96xf32>
    %71 = arith.divf %69, %70 : vector<8x96xf32>
    %72 = vector.extract_strided_slice %65 {offsets = [0, 96], sizes = [8, 32], strides = [1, 1]} : vector<8x128xf32> to vector<8x32xf32>
    %73 = math.tanh %72 : vector<8x32xf32>
    %74 = vector.extract_strided_slice %71 {offsets = [0, 0], sizes = [8, 32], strides = [1, 1]} : vector<8x96xf32> to vector<8x32xf32>
    %75 = vector.extract_strided_slice %71 {offsets = [0, 32], sizes = [8, 32], strides = [1, 1]} : vector<8x96xf32> to vector<8x32xf32>
    %76 = vector.extract_strided_slice %71 {offsets = [0, 64], sizes = [8, 32], strides = [1, 1]} : vector<8x96xf32> to vector<8x32xf32>
    %77 = arith.mulf %75, %60 : vector<8x32xf32>
    %78 = arith.mulf %74, %73 : vector<8x32xf32>
    %79 = arith.addf %77, %78 : vector<8x32xf32>
    %80 = math.tanh %79 : vector<8x32xf32>
    %81 = arith.mulf %76, %80 : vector<8x32xf32>
    %82 = vector.extract_strided_slice %2 {offsets = [32, 0], sizes = [8, 128], strides = [1, 1]} : vector<64x256xf32> to vector<8x128xf32>
    %cst_15 = arith.constant dense<0.000000e+00> : vector<8x128xf32>
    %83 = tpu.matmul %81, %3, %cst_15 {dimension_numbers = #tpu.dot_dimension_numbers<[1], [0], [0], [1], [0, 0, 1, 1], [], []>} : vector<8x32xf32>, vector<32x128xf32>, vector<8x128xf32> -> vector<8x128xf32>
    %84 = arith.addf %82, %83 : vector<8x128xf32>
    %85 = vector.extract_strided_slice %84 {offsets = [0, 0], sizes = [8, 96], strides = [1, 1]} : vector<8x128xf32> to vector<8x96xf32>
    %86 = arith.negf %85 : vector<8x96xf32>
    %87 = math.exp %86 : vector<8x96xf32>
    %cst_16 = arith.constant 1.000000e+00 : f32
    %88 = vector.broadcast %cst_16 : f32 to vector<8x96xf32>
    %89 = arith.addf %88, %87 : vector<8x96xf32>
    %90 = arith.divf %88, %89 : vector<8x96xf32>
    %91 = vector.extract_strided_slice %84 {offsets = [0, 96], sizes = [8, 32], strides = [1, 1]} : vector<8x128xf32> to vector<8x32xf32>
    %92 = math.tanh %91 : vector<8x32xf32>
    %93 = vector.extract_strided_slice %90 {offsets = [0, 0], sizes = [8, 32], strides = [1, 1]} : vector<8x96xf32> to vector<8x32xf32>
    %94 = vector.extract_strided_slice %90 {offsets = [0, 32], sizes = [8, 32], strides = [1, 1]} : vector<8x96xf32> to vector<8x32xf32>
    %95 = vector.extract_strided_slice %90 {offsets = [0, 64], sizes = [8, 32], strides = [1, 1]} : vector<8x96xf32> to vector<8x32xf32>
    %96 = arith.mulf %94, %79 : vector<8x32xf32>
    %97 = arith.mulf %93, %92 : vector<8x32xf32>
    %98 = arith.addf %96, %97 : vector<8x32xf32>
    %99 = math.tanh %98 : vector<8x32xf32>
    %100 = arith.mulf %95, %99 : vector<8x32xf32>
    %101 = vector.extract_strided_slice %2 {offsets = [40, 0], sizes = [8, 128], strides = [1, 1]} : vector<64x256xf32> to vector<8x128xf32>
    %cst_17 = arith.constant dense<0.000000e+00> : vector<8x128xf32>
    %102 = tpu.matmul %100, %3, %cst_17 {dimension_numbers = #tpu.dot_dimension_numbers<[1], [0], [0], [1], [0, 0, 1, 1], [], []>} : vector<8x32xf32>, vector<32x128xf32>, vector<8x128xf32> -> vector<8x128xf32>
    %103 = arith.addf %101, %102 : vector<8x128xf32>
    %104 = vector.extract_strided_slice %103 {offsets = [0, 0], sizes = [8, 96], strides = [1, 1]} : vector<8x128xf32> to vector<8x96xf32>
    %105 = arith.negf %104 : vector<8x96xf32>
    %106 = math.exp %105 : vector<8x96xf32>
    %cst_18 = arith.constant 1.000000e+00 : f32
    %107 = vector.broadcast %cst_18 : f32 to vector<8x96xf32>
    %108 = arith.addf %107, %106 : vector<8x96xf32>
    %109 = arith.divf %107, %108 : vector<8x96xf32>
    %110 = vector.extract_strided_slice %103 {offsets = [0, 96], sizes = [8, 32], strides = [1, 1]} : vector<8x128xf32> to vector<8x32xf32>
    %111 = math.tanh %110 : vector<8x32xf32>
    %112 = vector.extract_strided_slice %109 {offsets = [0, 0], sizes = [8, 32], strides = [1, 1]} : vector<8x96xf32> to vector<8x32xf32>
    %113 = vector.extract_strided_slice %109 {offsets = [0, 32], sizes = [8, 32], strides = [1, 1]} : vector<8x96xf32> to vector<8x32xf32>
    %114 = vector.extract_strided_slice %109 {offsets = [0, 64], sizes = [8, 32], strides = [1, 1]} : vector<8x96xf32> to vector<8x32xf32>
    %115 = arith.mulf %113, %98 : vector<8x32xf32>
    %116 = arith.mulf %112, %111 : vector<8x32xf32>
    %117 = arith.addf %115, %116 : vector<8x32xf32>
    %118 = math.tanh %117 : vector<8x32xf32>
    %119 = arith.mulf %114, %118 : vector<8x32xf32>
    %120 = vector.extract_strided_slice %2 {offsets = [48, 0], sizes = [8, 128], strides = [1, 1]} : vector<64x256xf32> to vector<8x128xf32>
    %cst_19 = arith.constant dense<0.000000e+00> : vector<8x128xf32>
    %121 = tpu.matmul %119, %3, %cst_19 {dimension_numbers = #tpu.dot_dimension_numbers<[1], [0], [0], [1], [0, 0, 1, 1], [], []>} : vector<8x32xf32>, vector<32x128xf32>, vector<8x128xf32> -> vector<8x128xf32>
    %122 = arith.addf %120, %121 : vector<8x128xf32>
    %123 = vector.extract_strided_slice %122 {offsets = [0, 0], sizes = [8, 96], strides = [1, 1]} : vector<8x128xf32> to vector<8x96xf32>
    %124 = arith.negf %123 : vector<8x96xf32>
    %125 = math.exp %124 : vector<8x96xf32>
    %cst_20 = arith.constant 1.000000e+00 : f32
    %126 = vector.broadcast %cst_20 : f32 to vector<8x96xf32>
    %127 = arith.addf %126, %125 : vector<8x96xf32>
    %128 = arith.divf %126, %127 : vector<8x96xf32>
    %129 = vector.extract_strided_slice %122 {offsets = [0, 96], sizes = [8, 32], strides = [1, 1]} : vector<8x128xf32> to vector<8x32xf32>
    %130 = math.tanh %129 : vector<8x32xf32>
    %131 = vector.extract_strided_slice %128 {offsets = [0, 0], sizes = [8, 32], strides = [1, 1]} : vector<8x96xf32> to vector<8x32xf32>
    %132 = vector.extract_strided_slice %128 {offsets = [0, 32], sizes = [8, 32], strides = [1, 1]} : vector<8x96xf32> to vector<8x32xf32>
    %133 = vector.extract_strided_slice %128 {offsets = [0, 64], sizes = [8, 32], strides = [1, 1]} : vector<8x96xf32> to vector<8x32xf32>
    %134 = arith.mulf %132, %117 : vector<8x32xf32>
    %135 = arith.mulf %131, %130 : vector<8x32xf32>
    %136 = arith.addf %134, %135 : vector<8x32xf32>
    %137 = math.tanh %136 : vector<8x32xf32>
    %138 = arith.mulf %133, %137 : vector<8x32xf32>
    %139 = vector.extract_strided_slice %2 {offsets = [56, 0], sizes = [8, 128], strides = [1, 1]} : vector<64x256xf32> to vector<8x128xf32>
    %cst_21 = arith.constant dense<0.000000e+00> : vector<8x128xf32>
    %140 = tpu.matmul %138, %3, %cst_21 {dimension_numbers = #tpu.dot_dimension_numbers<[1], [0], [0], [1], [0, 0, 1, 1], [], []>} : vector<8x32xf32>, vector<32x128xf32>, vector<8x128xf32> -> vector<8x128xf32>
    %141 = arith.addf %139, %140 : vector<8x128xf32>
    %142 = vector.extract_strided_slice %141 {offsets = [0, 0], sizes = [8, 96], strides = [1, 1]} : vector<8x128xf32> to vector<8x96xf32>
    %143 = arith.negf %142 : vector<8x96xf32>
    %144 = math.exp %143 : vector<8x96xf32>
    %cst_22 = arith.constant 1.000000e+00 : f32
    %145 = vector.broadcast %cst_22 : f32 to vector<8x96xf32>
    %146 = arith.addf %145, %144 : vector<8x96xf32>
    %147 = arith.divf %145, %146 : vector<8x96xf32>
    %148 = vector.extract_strided_slice %141 {offsets = [0, 96], sizes = [8, 32], strides = [1, 1]} : vector<8x128xf32> to vector<8x32xf32>
    %149 = math.tanh %148 : vector<8x32xf32>
    %150 = vector.extract_strided_slice %147 {offsets = [0, 0], sizes = [8, 32], strides = [1, 1]} : vector<8x96xf32> to vector<8x32xf32>
    %151 = vector.extract_strided_slice %147 {offsets = [0, 32], sizes = [8, 32], strides = [1, 1]} : vector<8x96xf32> to vector<8x32xf32>
    %152 = vector.extract_strided_slice %147 {offsets = [0, 64], sizes = [8, 32], strides = [1, 1]} : vector<8x96xf32> to vector<8x32xf32>
    %153 = arith.mulf %151, %136 : vector<8x32xf32>
    %154 = arith.mulf %150, %149 : vector<8x32xf32>
    %155 = arith.addf %153, %154 : vector<8x32xf32>
    %156 = math.tanh %155 : vector<8x32xf32>
    %157 = arith.mulf %152, %156 : vector<8x32xf32>
    %158 = vector.extract_strided_slice %2 {offsets = [56, 128], sizes = [8, 128], strides = [1, 1]} : vector<64x256xf32> to vector<8x128xf32>
    %cst_23 = arith.constant 0.000000e+00 : f32
    %159 = vector.broadcast %cst_23 : f32 to vector<8x32xf32>
    %160 = vector.extract_strided_slice %158 {offsets = [0, 0], sizes = [8, 96], strides = [1, 1]} : vector<8x128xf32> to vector<8x96xf32>
    %161 = arith.negf %160 : vector<8x96xf32>
    %162 = math.exp %161 : vector<8x96xf32>
    %cst_24 = arith.constant 1.000000e+00 : f32
    %163 = vector.broadcast %cst_24 : f32 to vector<8x96xf32>
    %164 = arith.addf %163, %162 : vector<8x96xf32>
    %165 = arith.divf %163, %164 : vector<8x96xf32>
    %166 = vector.extract_strided_slice %158 {offsets = [0, 96], sizes = [8, 32], strides = [1, 1]} : vector<8x128xf32> to vector<8x32xf32>
    %167 = math.tanh %166 : vector<8x32xf32>
    %168 = vector.extract_strided_slice %165 {offsets = [0, 0], sizes = [8, 32], strides = [1, 1]} : vector<8x96xf32> to vector<8x32xf32>
    %169 = vector.extract_strided_slice %165 {offsets = [0, 32], sizes = [8, 32], strides = [1, 1]} : vector<8x96xf32> to vector<8x32xf32>
    %170 = vector.extract_strided_slice %165 {offsets = [0, 64], sizes = [8, 32], strides = [1, 1]} : vector<8x96xf32> to vector<8x32xf32>
    %171 = arith.mulf %169, %159 : vector<8x32xf32>
    %172 = arith.mulf %168, %167 : vector<8x32xf32>
    %173 = arith.addf %171, %172 : vector<8x32xf32>
    %174 = math.tanh %173 : vector<8x32xf32>
    %175 = arith.mulf %170, %174 : vector<8x32xf32>
    %c32 = arith.constant 32 : index
    %c0_25 = arith.constant 0 : index
    %176 = vector.load %arg2[%c32, %c0_25] : memref<97x128xf32, #tpu.memory_space<vmem>>, vector<32x128xf32>
    %cst_26 = arith.constant dense<0.000000e+00> : vector<8x128xf32>
    %177 = tpu.matmul %157, %176, %cst_26 {dimension_numbers = #tpu.dot_dimension_numbers<[1], [0], [0], [1], [0, 0, 1, 1], [], []>} : vector<8x32xf32>, vector<32x128xf32>, vector<8x128xf32> -> vector<8x128xf32>
    %c64 = arith.constant 64 : index
    %c0_27 = arith.constant 0 : index
    %178 = vector.load %arg2[%c64, %c0_27] : memref<97x128xf32, #tpu.memory_space<vmem>>, vector<32x128xf32>
    %cst_28 = arith.constant dense<0.000000e+00> : vector<8x128xf32>
    %179 = tpu.matmul %175, %178, %cst_28 {dimension_numbers = #tpu.dot_dimension_numbers<[1], [0], [0], [1], [0, 0, 1, 1], [], []>} : vector<8x32xf32>, vector<32x128xf32>, vector<8x128xf32> -> vector<8x128xf32>
    %180 = arith.addf %177, %179 : vector<8x128xf32>
    %c96 = arith.constant 96 : index
    %c0_29 = arith.constant 0 : index
    %181 = vector.load %arg2[%c96, %c0_29] : memref<97x128xf32, #tpu.memory_space<vmem>>, vector<1x128xf32>
    %182 = vector.broadcast %181 : vector<1x128xf32> to vector<8x128xf32>
    %183 = arith.addf %180, %182 : vector<8x128xf32>
    %c0_30 = arith.constant 0 : index
    %c0_31 = arith.constant 0 : index
    %184 = vector.load %arg3[%c0_30, %c0_31] : memref<8x128xf32, #tpu.memory_space<vmem>>, vector<8x128xf32>
    tpu.vector_store %arg3[%c0_30, %c0_31], %183 {strides = array<i32>} : memref<8x128xf32, #tpu.memory_space<vmem>>, vector<8x128xf32>,
    return
  }
}

</mosaic_0001>

<bundles_post_ra>
// kernel: tpu_custom_call.1
= control target key start
LH: loop header
LB: loop body
LE: loop exit
PB: predicated region body
PF: predicated region fallthrough
CT: control target
= control target key end

     0   :  { %8 = vsyncpa [#allocation3], 0  ;;  %s1794_s0 = inlined_call_operand.vmem [shape: f32[64,17], index: 0, kind: input, shape index: {}]   ;;  %s1795_s1 = inlined_call_operand.vmem [shape: f32[17,256], index: 1, kind: input, shape index: {}]   ;;  %s1796_s2 = inlined_call_operand.hbm [shape: f32[97,128], index: 2, kind: input, shape index: {}]   ;;  %s1797_s3 = inlined_call_operand.hbm [shape: f32[8,128], index: 3, kind: output, shape index: {}]  }
   0x1   :  { %9 = vsyncpa [#allocation4], 0  ;;  %s1577_s12 = smov [#allocation2]   ;;  %s1529_s16 = scalar_lea.hbm %s1796_s2, 1664 }
   0x2   :  { %s19_s13 = sshll.u32 %s1577_s12, 4  ;;  %p1530_p0 = scmp.ne.s32.totalorder %s1796_s2, %s1529_s16  ;;  %s20_s13 = int_to_ptr.vmem [resolvable:$true] %s19_s13 }
   0x3   :  { %p1533_p1 = scmp.lt.u32.totalorder %s1529_s16, %s1796_s2 }
   0x5   :  { %p1535_p2 = pnand %p1533_p1, %p1530_p0 }
   0x7   :  { %1538 = shalt.err (!%p1535_p2)
}
   0x8   :  { %s1539_s21 = scalar_lea.vmem %s20_s13, 1664  ;;  %p1544_p4 = scmp.lt.s32.totalorder %s20_s13, %s20_s13 }
   0x9   :  { %p1540_p3 = scmp.ne.s32.totalorder %s20_s13, %s1539_s21  ;;  %p1545_p5 = scmp.lt.s32.totalorder %s1539_s21, %s1539_s21 }
   0xb   :  { %p1546_p6 = por %p1545_p5, %p1544_p4 }
   0xd   :  { %p1547_p7 = pnand %p1546_p6, %p1540_p3 }
   0xf   :  { %1550 = shalt.err (!%p1547_p7)
}
  0x10   :  { %s1578_s22 = smov 128   ;;  %s1579_s23 = smov 8  }
  0x11   :  { %25 = dma.hbm_to_vmem [thread:$0]  %s1796_s2, 1664, %s20_s13, [#allocation3], %s1578_s22, %s1578_s22, %s1579_s23  }
  0x12   :  { %1573 = dma.done.wait [#allocation3], 1664  }
  0x13   :  { %1574 = vsyncadd [#allocation3], 4294965632  ;;  %v1580_v0 = vmov 0.0|0.0   ;;  %v1581_v1 = vmov 0.0   ;;  %vm1582_vm0 = vmmov 0   ;;  %v38_v2 = vld [vmem:[%s1795_s1 + $0x8] sm:$0xff] }
  0x14   :  { %1381 = vmatprep.subr.bf16.mxu0 %v1580_v0  ;;  %139 = vmatprep.mubr.f32.mxu1 %v1581_v1  ;;  %v40_v3 = vld [vmem:[%s1795_s1 + $0x18] sm:$0xff]  ;;  %v181_v4 = vld [vmem:[#allocation2] sm:$0xff]  ;;  %v37_v7 = vld [vmem:[%s1795_s1] sm:$0xff]  ;;  %vm68_vm1 = vcmask 1040384   ;;  %vm43_vm2 = vcmask 138240   ;;  %s1584_s14 = smov 64  }
  0x15   :  { %1275 = vmatprep.mubr.msk.f32.mxu0 %vm1582_vm0, %v1581_v1  ;;  %v1377_v5 = vpack.c.bf16 %v40_v3, %v38_v2  ;;  %v182_v6 = vld [vmem:[#allocation2 + $0x8] sm:$0xff]  ;;  %v39_v8 = vld [vmem:[%s1795_s1 + $0x10] sm:$0xff]  ;;  %v42_v11 = vld [vmem:[%s1795_s1 + $0x28] sm:$0x1]  ;;  %vm185_vm3 = vcmask 261120  }
  0x16   :  { %v1634_v9 = vpack.c.bf16 %v182_v6, %v181_v4  ;;  %v1379_v10 = vpack.c.bf16 %v39_v8, %v37_v7  ;;  %v183_v12 = vld [vmem:[#allocation2 + $0x10] sm:$0xff]  ;;  %v184_v13 = vld [vmem:[#allocation2 + $0x18] sm:$0xff]  ;;  %v31_v52 = vld [vmem:[%s1794_s0 + $0x10] sm:$0xff] }
  0x17   :  { %1378 = vmatprep.subr.bf16.mxu1 %v1377_v5  ;;  %v1640_v14 = vpack.c.bf16 %v184_v13, %v183_v12  ;;  %v41_v15 = vld [vmem:[%s1795_s1 + $0x20] sm:$0x1]  ;;  %s1583_s1 = smov 32   ;;  %v30_v32 = vld [vmem:[%s1794_s0 + $0x8] sm:$0xff] }
  0x18   :  { %1383 = vmatpush3.bf16.msra.mxu0 %v1634_v9  ;;  %1380 = vmatpush1.bf16.msra.mxu1 %v1379_v10  ;;  %v29_v16 = vld [vmem:[%s1794_s0] sm:$0xff] }
  0x19   :  { %1384 = vmatprep.subr.bf16.mxu0 %v1580_v0  ;;  %1188 = vmatprep.subr.msk.mxu1 %vm68_vm1, %v42_v11  ;;  %v32_v11 = vld [vmem:[%s1794_s0 + $0x18] sm:$0xff] }
  0x1c   :  { %1386 = vmatpush3.bf16.msra.mxu0 %v1640_v14  ;;  %1189 = vmatpush1.msk.msra.mxu1 %vm68_vm1, %v41_v15 }
  0x1d   :  { %1190 = vmatmul.mubr.msk.f32.vlgmr.msra.gmra.mrb[0].mxu1 %vm43_vm2, %v29_v16  ;;  %1387 = vmatprep.subr.bf16.mxu0 %v1580_v0 }
  0x1e   :  { %144 = vmatprep.mubr.f32.mxu1 %v1581_v1  ;;  %1423 = vmatprep.subr.bf16.mxu1 %v1580_v0 }
  0x1f   :  { %1276 = vmatmul.mubr.f32.vlgmr.msra.gmra.mrb[0].mxu0 %v1581_v1  ;;  %1425 = vmatpush3.bf16.msra.mxu1 %v1634_v9 }
  0x20   :  { %1389 = vmatpush3.bf16.msra.mxu0 %v1634_v9  ;;  %1286 = vmatprep.mubr.msk.f32.mxu0 %vm1582_vm0, %v1581_v1 }
  0x21   :  { %1390 = vmatprep.subr.bf16.mxu0 %v1580_v0  ;;  %1426 = vmatprep.subr.bf16.mxu1 %v1580_v0 }
  0x22   :  { %1191 = vmatmul.mubr.msk.f32.gmra.mrb[2].mxu1 %vm43_vm2, %v30_v32  ;;  %v33_v32 = vld [vmem:[%s1794_s0 + $0x20] sm:$0xff] }
  0x23   :  { %1428 = vmatpush3.bf16.msra.mxu1 %v1640_v14  ;;  %149 = vmatprep.mubr.f32.mxu1 %v1581_v1 }
  0x24   :  { %1392 = vmatpush3.bf16.msra.mxu0 %v1640_v14  ;;  %1429 = vmatprep.subr.bf16.mxu1 %v1580_v0 }
  0x25   :  { %1393 = vmatprep.subr.bf16.mxu0 %v1580_v0 }
  0x26   :  { %1192 = vmatmul.mubr.msk.f32.gmra.mrb[4].mxu1 %vm43_vm2, %v31_v52  ;;  %v34_v52 = vld [vmem:[%s1794_s0 + $0x28] sm:$0xff] }
  0x27   :  { %154 = vmatprep.mubr.f32.mxu1 %v1581_v1 }
  0x2a   :  { %1193 = vmatmul.mubr.msk.f32.gmra.mrb[6].mxu1 %vm43_vm2, %v32_v11 }
  0x2b   :  { %159 = vmatprep.mubr.f32.mxu1 %v1581_v1 }
  0x2e   :  { %1194 = vmatmul.mubr.msk.f32.gmra.mrb[8].mxu1 %vm43_vm2, %v33_v32 }
  0x2f   :  { %164 = vmatprep.mubr.f32.mxu1 %v1581_v1 }
  0x32   :  { %1195 = vmatmul.mubr.msk.f32.gmra.mrb[10].mxu1 %vm43_vm2, %v34_v52 }
  0x33   :  { %169 = vmatprep.mubr.f32.mxu1 %v1581_v1 }
  0xf0   :  { %v141_v17 = vpop.f32.mrb[0].mxu1 }
  0xf1   :  { %v143_v18 = vpop.f32.mrb[1].mxu1 }
  0xf2   :  { %v255_v19 = vpop.f32.mrb[0].mxu0 }
  0xf3   :  { %v259_v20 = vadd.f32 %v255_v19, %v141_v17  ;;  %v1277_v21 = vpop.f32.mrb[1].mxu0 }
  0xf5   :  { %1457 = vtanh.f32 %v259_v20  ;;  %v1198_v23 = vmul.f32 -1.442695, %v259_v20  ;;  %v146_v36 = vpop.f32.mrb[2].mxu1 }
  0xf6   :  { %v148_v37 = vpop.f32.mrb[3].mxu1 }
  0xf7   :  { %1459 = vpow2.f32 %v1198_v23 }
  0xf9   :  { %v151_v56 = vpop.f32.mrb[4].mxu1 }
  0xfa   :  { %v153_v57 = vpop.f32.mrb[5].mxu1 }
  0xfd   :  { %v156_v16 = vpop.f32.mrb[6].mxu1 }
  0xfe   :  { %v158_v17 = vpop.f32.mrb[7].mxu1 }
  0xff   :  { %v1458_v22 = vpop.eup %1457 }
 0x100   :  { %269 = vrot.lane.b32.xlu0 %v1458_v22, %s1583_s1 }
 0x101   :  { %v1460_v24 = vpop.eup %1459 }
 0x102   :  { %v263_v25 = vadd.f32 1.0, %v1460_v24 }
 0x104   :  { %1461 = vrcp.f32 %v263_v25 }
 0x10e   :  { %v1462_v26 = vpop.eup %1461 }
 0x10f   :  { %v267_v29 = vmul.f32 0.0, %v1462_v26 }
 0x172   :  { %v270_v27 = vpop.permute.xlu0 %269 }
 0x173   :  { %v272_v28 = vmul.f32 %v1462_v26, %v270_v27 }
 0x175   :  { %274 = vrot.lane.b32.xlu0 %v272_v28, %s1583_s1 }
 0x1e7   :  { %v275_v30 = vpop.permute.xlu0 %274 }
 0x1e8   :  { %v277_v31 = vadd.f32 %v275_v30, %v267_v29 }
 0x1ea   :  { %1463 = vtanh.f32 %v277_v31 }
 0x1f4   :  { %v1464_v33 = vpop.eup %1463 }
 0x1f5   :  { %280 = vrot.lane.b32.xlu1 %v1464_v33, %s1583_s1 }
 0x267   :  { %v281_v34 = vpop.permute.xlu1 %280 }
 0x268   :  { %v283_v35 = vmul.f32 %v1462_v26, %v281_v34 }
 0x26a   :  { %285 = vrot.lane.b32.xlu1 %v283_v35, %s1584_s14 }
 0x2dc   :  { %v286_v38 = vpop.permute.xlu1 %285 }
 0x2dd   :  { %1287 = vmatmul.mubr.msk.f32.vlgmr.msra.gmra.mrb[2].mxu0 %vm185_vm3, %v286_v38 }
 0x2de   :  { %1395 = vmatpush3.bf16.msra.mxu0 %v1634_v9  ;;  %1297 = vmatprep.mubr.msk.f32.mxu0 %vm1582_vm0, %v1581_v1 }
 0x2df   :  { %1396 = vmatprep.subr.bf16.mxu0 %v1580_v0 }
 0x2e2   :  { %1398 = vmatpush3.bf16.msra.mxu0 %v1640_v14 }
 0x2e3   :  { %1399 = vmatprep.subr.bf16.mxu0 %v1580_v0 }
 0x3b0   :  { %v355_v39 = vpop.f32.mrb[2].mxu0 }
 0x3b1   :  { %v359_v40 = vadd.f32 %v355_v39, %v146_v36  ;;  %v1288_v41 = vpop.f32.mrb[3].mxu0  ;;  %v161_v36 = vpop.f32.mrb[8].mxu1 }
 0x3b2   :  { %v163_v37 = vpop.f32.mrb[9].mxu1 }
 0x3b3   :  { %1465 = vtanh.f32 %v359_v40  ;;  %v1200_v43 = vmul.f32 -1.442695, %v359_v40 }
 0x3b5   :  { %1467 = vpow2.f32 %v1200_v43 }
 0x3bd   :  { %v1466_v42 = vpop.eup %1465 }
 0x3be   :  { %369 = vrot.lane.b32.xlu0 %v1466_v42, %s1583_s1 }
 0x3bf   :  { %v1468_v44 = vpop.eup %1467 }
 0x3c0   :  { %v363_v45 = vadd.f32 1.0, %v1468_v44 }
 0x3c2   :  { %1469 = vrcp.f32 %v363_v45 }
 0x3cc   :  { %v1470_v46 = vpop.eup %1469 }
 0x3cd   :  { %v367_v49 = vmul.f32 %v1470_v46, %v277_v31 }
 0x430   :  { %v370_v47 = vpop.permute.xlu0 %369 }
 0x431   :  { %v372_v48 = vmul.f32 %v1470_v46, %v370_v47 }
 0x433   :  { %374 = vrot.lane.b32.xlu1 %v372_v48, %s1583_s1 }
 0x4a5   :  { %v375_v50 = vpop.permute.xlu1 %374 }
 0x4a6   :  { %v377_v51 = vadd.f32 %v375_v50, %v367_v49 }
 0x4a8   :  { %1471 = vtanh.f32 %v377_v51 }
 0x4b2   :  { %v1472_v53 = vpop.eup %1471 }
 0x4b3   :  { %380 = vrot.lane.b32.xlu0 %v1472_v53, %s1583_s1 }
 0x525   :  { %v381_v54 = vpop.permute.xlu0 %380 }
 0x526   :  { %v383_v55 = vmul.f32 %v1470_v46, %v381_v54 }
 0x528   :  { %385 = vrot.lane.b32.xlu1 %v383_v55, %s1584_s14 }
 0x59a   :  { %v386_v58 = vpop.permute.xlu1 %385 }
 0x59b   :  { %1298 = vmatmul.mubr.msk.f32.vlgmr.msra.gmra.mrb[4].mxu0 %vm185_vm3, %v386_v58 }
 0x59c   :  { %1401 = vmatpush3.bf16.msra.mxu0 %v1634_v9  ;;  %1308 = vmatprep.mubr.msk.f32.mxu0 %vm1582_vm0, %v1581_v1 }
 0x59d   :  { %1402 = vmatprep.subr.bf16.mxu0 %v1580_v0 }
 0x5a0   :  { %1404 = vmatpush3.bf16.msra.mxu0 %v1640_v14 }
 0x5a1   :  { %1405 = vmatprep.subr.bf16.mxu0 %v1580_v0 }
 0x66e   :  { %v455_v59 = vpop.f32.mrb[4].mxu0 }
 0x66f   :  { %v459_v60 = vadd.f32 %v455_v59, %v151_v56  ;;  %v1299_v61 = vpop.f32.mrb[5].mxu0  ;;  %v166_v56 = vpop.f32.mrb[10].mxu1 }
 0x670   :  { %v168_v57 = vpop.f32.mrb[11].mxu1 }
 0x671   :  { %1473 = vtanh.f32 %v459_v60  ;;  %v1202_v63 = vmul.f32 -1.442695, %v459_v60  ;;  %v1015_v57 = vld [vmem:[#allocation2 + $0x58] sm:$0xff] }
 0x673   :  { %1475 = vpow2.f32 %v1202_v63 }
 0x67b   :  { %v1474_v62 = vpop.eup %1473 }
 0x67c   :  { %469 = vrot.lane.b32.xlu0 %v1474_v62, %s1583_s1 }
 0x67d   :  { %v1476_v2 = vpop.eup %1475 }
 0x67e   :  { %v463_v3 = vadd.f32 1.0, %v1476_v2 }
 0x680   :  { %1477 = vrcp.f32 %v463_v3 }
 0x68a   :  { %v1478_v4 = vpop.eup %1477 }
 0x68b   :  { %v467_v7 = vmul.f32 %v1478_v4, %v377_v51 }
 0x6ee   :  { %v470_v5 = vpop.permute.xlu0 %469 }
 0x6ef   :  { %v472_v6 = vmul.f32 %v1478_v4, %v470_v5 }
 0x6f1   :  { %474 = vrot.lane.b32.xlu1 %v472_v6, %s1583_s1 }
 0x763   :  { %v475_v8 = vpop.permute.xlu1 %474 }
 0x764   :  { %v477_v10 = vadd.f32 %v475_v8, %v467_v7  ;;  %v35_v8 = vld [vmem:[%s1794_s0 + $0x30] sm:$0xff] }
 0x765   :  { %1196 = vmatmul.mubr.msk.f32.gmra.mrb[12].mxu1 %vm43_vm2, %v35_v8  ;;  %v1010_v8 = vld [vmem:[#allocation2 + $0x30] sm:$0xff] }
 0x766   :  { %1479 = vtanh.f32 %v477_v10  ;;  %174 = vmatprep.mubr.f32.mxu1 %v1581_v1 }
 0x770   :  { %v1480_v12 = vpop.eup %1479 }
 0x771   :  { %480 = vrot.lane.b32.xlu0 %v1480_v12, %s1583_s1 }
 0x7e3   :  { %v481_v13 = vpop.permute.xlu0 %480 }
 0x7e4   :  { %v483_v15 = vmul.f32 %v1478_v4, %v481_v13 }
 0x7e6   :  { %485 = vrot.lane.b32.xlu1 %v483_v15, %s1584_s14 }
 0x838   :  { %v171_v13 = vpop.f32.mrb[12].mxu1 }
 0x839   :  { %v173_v15 = vpop.f32.mrb[13].mxu1 }
 0x858   :  { %v486_v18 = vpop.permute.xlu1 %485 }
 0x859   :  { %1309 = vmatmul.mubr.msk.f32.vlgmr.msra.gmra.mrb[6].mxu0 %vm185_vm3, %v486_v18 }
 0x85a   :  { %1407 = vmatpush3.bf16.msra.mxu0 %v1634_v9  ;;  %1319 = vmatprep.mubr.msk.f32.mxu0 %vm1582_vm0, %v1581_v1 }
 0x85b   :  { %1408 = vmatprep.subr.bf16.mxu0 %v1580_v0 }
 0x85e   :  { %1410 = vmatpush3.bf16.msra.mxu0 %v1640_v14 }
 0x85f   :  { %1411 = vmatprep.subr.bf16.mxu0 %v1580_v0 }
 0x92c   :  { %v555_v19 = vpop.f32.mrb[6].mxu0 }
 0x92d   :  { %v559_v20 = vadd.f32 %v555_v19, %v156_v16  ;;  %v1310_v21 = vpop.f32.mrb[7].mxu0 }
 0x92f   :  { %1481 = vtanh.f32 %v559_v20  ;;  %v1204_v23 = vmul.f32 -1.442695, %v559_v20  ;;  %v36_v20 = vld [vmem:[%s1794_s0 + $0x38] sm:$0xff]  ;;  %s1585_s0 = smov [#allocation5]  }
 0x930   :  { %1197 = vmatmul.mubr.msk.f32.gmra.mrb[14].mxu1 %vm43_vm2, %v36_v20  ;;  %v1216_v20 = vld [vmem:[#allocation2 + $0x60] ss:$0 sm:$0xff]  ;;  %s1179_s27 = sshll.u32 %s1585_s0, 4  ;;  %s1180_s27 = int_to_ptr.vmem [resolvable:$true] %s1179_s27 }
 0x931   :  { %1483 = vpow2.f32 %v1204_v23  ;;  %1352 = vmatprep.mubr.msk.f32.mxu1 %vm1582_vm0, %v1581_v1  ;;  %s1551_s28 = scalar_lea.vmem %s1180_s27, 128  ;;  %p1556_p9 = scmp.lt.s32.totalorder %s1180_s27, %s1180_s27 }
 0x932   :  { %p1552_p8 = scmp.ne.s32.totalorder %s1180_s27, %s1551_s28  ;;  %p1557_p10 = scmp.lt.s32.totalorder %s1551_s28, %s1551_s28 }
 0x934   :  { %p1558_p11 = por %p1557_p10, %p1556_p9 }
 0x936   :  { %p1559_p12 = pnand %p1558_p11, %p1552_p8 }
 0x939   :  { %v1482_v22 = vpop.eup %1481 }
 0x93a   :  { %569 = vrot.lane.b32.xlu0 %v1482_v22, %s1583_s1 }
 0x93b   :  { %v1484_v24 = vpop.eup %1483 }
 0x93c   :  { %v563_v25 = vadd.f32 1.0, %v1484_v24 }
 0x93e   :  { %1485 = vrcp.f32 %v563_v25 }
 0x948   :  { %v1486_v26 = vpop.eup %1485 }
 0x949   :  { %v567_v29 = vmul.f32 %v1486_v26, %v477_v10 }
 0x9ac   :  { %v570_v27 = vpop.permute.xlu0 %569 }
 0x9ad   :  { %v572_v28 = vmul.f32 %v1486_v26, %v570_v27 }
 0x9af   :  { %574 = vrot.lane.b32.xlu1 %v572_v28, %s1583_s1 }
 0xa03   :  { %v176_v28 = vpop.f32.mrb[14].mxu1 }
 0xa21   :  { %v575_v30 = vpop.permute.xlu1 %574 }
 0xa22   :  { %v577_v31 = vadd.f32 %v575_v30, %v567_v29  ;;  %v178_v29 = vpop.f32.mrb[15].mxu1 }
 0xa24   :  { %1487 = vtanh.f32 %v577_v31 }
 0xa2e   :  { %v1488_v33 = vpop.eup %1487 }
 0xa2f   :  { %580 = vrot.lane.b32.xlu0 %v1488_v33, %s1583_s1 }
 0xaa1   :  { %v581_v34 = vpop.permute.xlu0 %580 }
 0xaa2   :  { %v583_v35 = vmul.f32 %v1486_v26, %v581_v34 }
 0xaa4   :  { %585 = vrot.lane.b32.xlu1 %v583_v35, %s1584_s14  ;;  %v1213_v35 = vmul.f32 -1.442695, %v178_v29 }
 0xb16   :  { %v586_v38 = vpop.permute.xlu1 %585 }
 0xb17   :  { %1320 = vmatmul.mubr.msk.f32.vlgmr.msra.gmra.mrb[8].mxu0 %vm185_vm3, %v586_v38 }
 0xb18   :  { %1413 = vmatpush3.bf16.msra.mxu0 %v1634_v9  ;;  %1330 = vmatprep.mubr.msk.f32.mxu0 %vm1582_vm0, %v1581_v1 }
 0xb19   :  { %1414 = vmatprep.subr.bf16.mxu0 %v1580_v0 }
 0xb1c   :  { %1416 = vmatpush3.bf16.msra.mxu0 %v1640_v14 }
 0xb1d   :  { %1417 = vmatprep.subr.bf16.mxu0 %v1580_v0 }
 0xbea   :  { %v655_v39 = vpop.f32.mrb[8].mxu0 }
 0xbeb   :  { %v659_v40 = vadd.f32 %v655_v39, %v161_v36  ;;  %v1321_v41 = vpop.f32.mrb[9].mxu0 }
 0xbed   :  { %1489 = vtanh.f32 %v659_v40  ;;  %v1206_v43 = vmul.f32 -1.442695, %v659_v40 }
 0xbef   :  { %1491 = vpow2.f32 %v1206_v43 }
 0xbf7   :  { %v1490_v42 = vpop.eup %1489 }
 0xbf8   :  { %669 = vrot.lane.b32.xlu0 %v1490_v42, %s1583_s1 }
 0xbf9   :  { %v1492_v44 = vpop.eup %1491 }
 0xbfa   :  { %v663_v45 = vadd.f32 1.0, %v1492_v44 }
 0xbfc   :  { %1493 = vrcp.f32 %v663_v45 }
 0xc06   :  { %v1494_v46 = vpop.eup %1493 }
 0xc07   :  { %v667_v49 = vmul.f32 %v1494_v46, %v577_v31 }
 0xc6a   :  { %v670_v47 = vpop.permute.xlu0 %669 }
 0xc6b   :  { %v672_v48 = vmul.f32 %v1494_v46, %v670_v47 }
 0xc6d   :  { %674 = vrot.lane.b32.xlu1 %v672_v48, %s1583_s1 }
 0xcdf   :  { %v675_v50 = vpop.permute.xlu1 %674 }
 0xce0   :  { %v677_v51 = vadd.f32 %v675_v50, %v667_v49  ;;  %v1012_v50 = vld [vmem:[#allocation2 + $0x40] sm:$0xff] }
 0xce2   :  { %1495 = vtanh.f32 %v677_v51 }
 0xcec   :  { %v1496_v53 = vpop.eup %1495 }
 0xced   :  { %680 = vrot.lane.b32.xlu0 %v1496_v53, %s1583_s1 }
 0xd5f   :  { %v681_v54 = vpop.permute.xlu0 %680 }
 0xd60   :  { %v683_v55 = vmul.f32 %v1494_v46, %v681_v54 }
 0xd62   :  { %685 = vrot.lane.b32.xlu1 %v683_v55, %s1584_s14 }
 0xdd4   :  { %v686_v58 = vpop.permute.xlu1 %685 }
 0xdd5   :  { %1331 = vmatmul.mubr.msk.f32.vlgmr.msra.gmra.mrb[10].mxu0 %vm185_vm3, %v686_v58 }
 0xdd6   :  { %1419 = vmatpush3.bf16.msra.mxu0 %v1634_v9  ;;  %1341 = vmatprep.mubr.msk.f32.mxu0 %vm1582_vm0, %v1581_v1 }
 0xdd7   :  { %1420 = vmatprep.subr.bf16.mxu0 %v1580_v0 }
 0xdda   :  { %1422 = vmatpush3.bf16.msra.mxu0 %v1640_v14 }
 0xea8   :  { %v755_v59 = vpop.f32.mrb[10].mxu0 }
 0xea9   :  { %v759_v60 = vadd.f32 %v755_v59, %v166_v56  ;;  %v1332_v61 = vpop.f32.mrb[11].mxu0  ;;  %v1014_v56 = vld [vmem:[#allocation2 + $0x50] sm:$0xff] }
 0xeaa   :  { %v1433_v58 = vpack.c.bf16 %v1015_v57, %v1014_v56 }
 0xeab   :  { %1497 = vtanh.f32 %v759_v60  ;;  %v1208_v63 = vmul.f32 -1.442695, %v759_v60 }
 0xead   :  { %1499 = vpow2.f32 %v1208_v63 }
 0xeb5   :  { %v1498_v62 = vpop.eup %1497 }
 0xeb6   :  { %769 = vrot.lane.b32.xlu0 %v1498_v62, %s1583_s1 }
 0xeb7   :  { %v1500_v2 = vpop.eup %1499 }
 0xeb8   :  { %v763_v3 = vadd.f32 1.0, %v1500_v2 }
 0xeba   :  { %1501 = vrcp.f32 %v763_v3 }
 0xec4   :  { %v1502_v9 = vpop.eup %1501 }
 0xec5   :  { %v767_v6 = vmul.f32 %v1502_v9, %v677_v51  ;;  %v1013_v51 = vld [vmem:[#allocation2 + $0x48] sm:$0xff] }
 0xec6   :  { %v1430_v53 = vpack.c.bf16 %v1013_v51, %v1012_v50 }
 0xf28   :  { %v770_v4 = vpop.permute.xlu0 %769 }
 0xf29   :  { %v772_v5 = vmul.f32 %v1502_v9, %v770_v4 }
 0xf2b   :  { %774 = vrot.lane.b32.xlu1 %v772_v5, %s1583_s1 }
 0xf9d   :  { %v775_v7 = vpop.permute.xlu1 %774 }
 0xf9e   :  { %v777_v14 = vadd.f32 %v775_v7, %v767_v6  ;;  %v1008_v7 = vld [vmem:[#allocation2 + $0x20] sm:$0xff] }
 0xfa0   :  { %1503 = vtanh.f32 %v777_v14 }
 0xfaa   :  { %v1504_v10 = vpop.eup %1503 }
 0xfab   :  { %780 = vrot.lane.b32.xlu0 %v1504_v10, %s1583_s1 }
0x101d   :  { %v781_v11 = vpop.permute.xlu0 %780 }
0x101e   :  { %v783_v12 = vmul.f32 %v1502_v9, %v781_v11 }
0x1020   :  { %785 = vrot.lane.b32.xlu1 %v783_v12, %s1584_s14 }
0x1092   :  { %v786_v16 = vpop.permute.xlu1 %785 }
0x1093   :  { %1342 = vmatmul.mubr.msk.f32.vlgmr.msra.gmra.mrb[12].mxu0 %vm185_vm3, %v786_v16 }
0x1166   :  { %v855_v17 = vpop.f32.mrb[12].mxu0 }
0x1167   :  { %v859_v18 = vadd.f32 %v855_v17, %v171_v13  ;;  %v1343_v19 = vpop.f32.mrb[13].mxu0 }
0x1169   :  { %1505 = vtanh.f32 %v859_v18  ;;  %v1210_v22 = vmul.f32 -1.442695, %v859_v18 }
0x116b   :  { %1507 = vpow2.f32 %v1210_v22 }
0x1173   :  { %v1506_v21 = vpop.eup %1505 }
0x1174   :  { %869 = vrot.lane.b32.xlu0 %v1506_v21, %s1583_s1 }
0x1175   :  { %v1508_v23 = vpop.eup %1507 }
0x1176   :  { %v863_v24 = vadd.f32 1.0, %v1508_v23 }
0x1178   :  { %1509 = vrcp.f32 %v863_v24 }
0x1182   :  { %v1510_v25 = vpop.eup %1509 }
0x1183   :  { %v867_v30 = vmul.f32 %v1510_v25, %v777_v14  ;;  %v1009_v14 = vld [vmem:[#allocation2 + $0x28] sm:$0xff] }
0x1184   :  { %v1436_v11 = vpack.c.bf16 %v1009_v14, %v1008_v7 }
0x11e6   :  { %v870_v26 = vpop.permute.xlu0 %869 }
0x11e7   :  { %v872_v27 = vmul.f32 %v1510_v25, %v870_v26 }
0x11e9   :  { %874 = vrot.lane.b32.xlu1 %v872_v27, %s1583_s1 }
0x125b   :  { %v875_v31 = vpop.permute.xlu1 %874 }
0x125c   :  { %v877_v32 = vadd.f32 %v875_v31, %v867_v30 }
0x125e   :  { %1511 = vtanh.f32 %v877_v32 }
0x125f   :  { %1513 = vtanh.f32 %v178_v29 }
0x1260   :  { %1515 = vpow2.f32 %v1213_v35 }
0x1268   :  { %v1512_v33 = vpop.eup %1511 }
0x1269   :  { %880 = vrot.lane.b32.xlu0 %v1512_v33, %s1583_s1  ;;  %v1514_v34 = vpop.eup %1513 }
0x126a   :  { %v1516_v36 = vpop.eup %1515 }
0x126b   :  { %v987_v37 = vadd.f32 1.0, %v1516_v36 }
0x126d   :  { %993 = vrot.lane.b32.xlu0 %v1514_v34, %s1583_s1  ;;  %1517 = vrcp.f32 %v987_v37 }
0x1277   :  { %v1518_v40 = vpop.eup %1517 }
0x1278   :  { %v991_v44 = vmul.f32 0.0, %v1518_v40 }
0x12db   :  { %v881_v38 = vpop.permute.xlu0 %880 }
0x12dc   :  { %v883_v39 = vmul.f32 %v1510_v25, %v881_v38 }
0x12de   :  { %885 = vrot.lane.b32.xlu1 %v883_v39, %s1584_s14 }
0x12df   :  { %v994_v41 = vpop.permute.xlu0 %993 }
0x12e0   :  { %v996_v42 = vmul.f32 %v1518_v40, %v994_v41 }
0x12e2   :  { %998 = vrot.lane.b32.xlu0 %v996_v42, %s1583_s1 }
0x1350   :  { %v886_v43 = vpop.permute.xlu1 %885 }
0x1351   :  { %1353 = vmatmul.mubr.msk.f32.vlgmr.msra.gmra.mrb[16].mxu1 %vm185_vm3, %v886_v43 }
0x1352   :  { %1363 = vmatprep.mubr.msk.f32.mxu1 %vm1582_vm0, %v1581_v1  ;;  %1431 = vmatpush3.bf16.msra.mxu1 %v1430_v53 }
0x1353   :  { %1432 = vmatprep.subr.bf16.mxu1 %v1580_v0 }
0x1354   :  { %v999_v45 = vpop.permute.xlu0 %998 }
0x1355   :  { %v1001_v46 = vadd.f32 %v999_v45, %v991_v44 }
0x1356   :  { %1434 = vmatpush3.bf16.msra.mxu1 %v1433_v58 }
0x1357   :  { %1519 = vtanh.f32 %v1001_v46  ;;  %1435 = vmatprep.subr.bf16.mxu1 %v1580_v0 }
0x1361   :  { %v1520_v47 = vpop.eup %1519 }
0x1362   :  { %1004 = vrot.lane.b32.xlu0 %v1520_v47, %s1583_s1 }
0x13d4   :  { %v1005_v48 = vpop.permute.xlu0 %1004 }
0x13d5   :  { %v1007_v49 = vmul.f32 %v1518_v40, %v1005_v48 }
0x13d7   :  { %1017 = vrot.lane.b32.xlu0 %v1007_v49, %s1584_s14 }
0x1424   :  { %v955_v52 = vpop.f32.mrb[16].mxu1 }
0x1425   :  { %v959_v54 = vadd.f32 %v955_v52, %v176_v28  ;;  %v1354_v55 = vpop.f32.mrb[17].mxu1 }
0x1427   :  { %1521 = vtanh.f32 %v959_v54  ;;  %v1212_v61 = vmul.f32 -1.442695, %v959_v54 }
0x1429   :  { %1523 = vpow2.f32 %v1212_v61 }
0x1431   :  { %v1522_v59 = vpop.eup %1521 }
0x1432   :  { %969 = vrot.lane.b32.xlu1 %v1522_v59, %s1583_s1 }
0x1433   :  { %v1524_v62 = vpop.eup %1523 }
0x1434   :  { %v963_v63 = vadd.f32 1.0, %v1524_v62 }
0x1436   :  { %1525 = vrcp.f32 %v963_v63 }
0x1440   :  { %v1526_v2 = vpop.eup %1525 }
0x1441   :  { %v967_v4 = vmul.f32 %v1526_v2, %v877_v32 }
0x1449   :  { %v1018_v60 = vpop.permute.xlu0 %1017 }
0x144a   :  { %1364 = vmatmul.mubr.msk.f32.vlgmr.msra.gmra.mrb[18].mxu1 %vm185_vm3, %v1018_v60 }
0x144b   :  { %1374 = vmatprep.mubr.msk.f32.mxu1 %vm1582_vm0, %v1581_v1  ;;  %v1011_v1 = vld [vmem:[#allocation2 + $0x38] sm:$0xff]  ;;  %1437 = vmatpush3.bf16.msra.mxu1 %v1436_v11 }
0x144c   :  { %v1439_v13 = vpack.c.bf16 %v1011_v1, %v1010_v8  ;;  %1438 = vmatprep.subr.bf16.mxu1 %v1580_v0 }
0x144f   :  { %1440 = vmatpush3.bf16.msra.mxu1 %v1439_v13 }
0x14a4   :  { %v970_v3 = vpop.permute.xlu1 %969 }
0x14a5   :  { %v972_v9 = vmul.f32 %v1526_v2, %v970_v3 }
0x14a7   :  { %974 = vrot.lane.b32.xlu1 %v972_v9, %s1583_s1 }
0x1519   :  { %v975_v5 = vpop.permute.xlu1 %974 }
0x151a   :  { %v977_v6 = vadd.f32 %v975_v5, %v967_v4 }
0x151c   :  { %1527 = vtanh.f32 %v977_v6 }
0x151d   :  { %v1087_v10 = vpop.f32.mrb[18].mxu1 }
0x151e   :  { %v1365_v12 = vpop.f32.mrb[19].mxu1 }
0x1526   :  { %v1528_v15 = vpop.eup %1527 }
0x1527   :  { %980 = vrot.lane.b32.xlu1 %v1528_v15, %s1583_s1 }
0x1599   :  { %v981_v16 = vpop.permute.xlu1 %980 }
0x159a   :  { %v983_v17 = vmul.f32 %v1526_v2, %v981_v16 }
0x159c   :  { %1092 = vrot.lane.b32.xlu1 %v983_v17, %s1584_s14 }
0x160e   :  { %v1093_v18 = vpop.permute.xlu1 %1092 }
0x160f   :  { %1375 = vmatmul.mubr.msk.f32.vlgmr.msra.gmra.mrb[20].mxu1 %vm185_vm3, %v1093_v18 }
0x16e2   :  { %v1162_v19 = vpop.f32.mrb[20].mxu1 }
0x16e3   :  { %v1163_v21 = vadd.f32 %v1162_v19, %v1087_v10  ;;  %v1376_v22 = vpop.f32.mrb[21].mxu1 }
0x16e5   :  { %v1171_v23 = vadd.f32 %v1216_v20, %v1163_v21 }
0x16e7   :  { %1172 = vst [vmem:[#allocation5] sm:$0xff] %v1171_v23 }
0x16e8   :  { %1562 = shalt.err (!%p1559_p12)
}
0x16e9   :  { %s1563_s30 = scalar_lea.hbm %s1797_s3, 128 }
0x16ea   :  { %p1564_p13 = scmp.ne.s32.totalorder %s1797_s3, %s1563_s30  ;;  %p1567_p0 = scmp.lt.u32.totalorder %s1563_s30, %s1797_s3 }
0x16ec   :  { %p1569_p1 = pnand %p1567_p0, %p1564_p13 }
0x16ee   :  { %1572 = shalt.err (!%p1569_p1)
}
0x16ef   :  { %1182 = dma.vmem_to_hbm [thread:$0]  %s1180_s27, 128, %s1797_s3, [#allocation4]  }
0x16f0   :  { %1575 = dma.done.wait [#allocation4], 128  }
0x16f1   :  { %1576 = vsyncadd [#allocation4], 4294967168 }
0x16f2   :  { %1186 = vsyncpa [#allocation3], 1 }
0x16f3   :  { %1187 = vsyncpa [#allocation4], 1 }

</bundles_post_ra>
